<compile_context>
chip_gen: v6e
topology: v6e:2x2x1
jax: 0.10.0
libtpu: 0.0.40
codegen_flags: <defaults>
</compile_context>

<pallas_src>
import jax
import jax.numpy as jnp
from jax.experimental import pallas as pl
from jax.experimental.pallas import tpu as pltpu

TEMP = 0.01
INV_TEMP = 1.0 / TEMP          # 100.0
HALF_INV_TEMP = 0.5 * INV_TEMP  # 50.0  (tanh form uses z/2)
K_VALS = (1, 2, 4, 8, 16)


def _recall_at_k_kernel(txt_ref, img_ref, diag_ref, out_ref):
    # txt_ref:  (TM, D)   text rows for this row tile, pre-scaled by 0.5/temp
    # img_ref:  (TN, D)   image rows acting as sims "columns" for this column tile
    # diag_ref: (TM, LW)  lane-replicated 0.5/temp * <txt_i, img_i>
    # out_ref:  (TM, LW)  lane-partial running sum of tanh(0.5*(sims-diag)/temp),
    #                     revisited across the column (reduction) axis.
    j = pl.program_id(1)

    @pl.when(j == 0)
    def _init():
        out_ref[...] = jnp.zeros_like(out_ref)

    # sims_half[m, n] = (0.5/temp) * <txt_m, img_n>.  Transposed-RHS contraction
    # (same dnums as the flash-attention q·kT path) -> MXU, f32 accumulate.
    sims_half = jax.lax.dot_general(
        txt_ref[...],
        img_ref[...],
        dimension_numbers=(((1,), (1,)), ((), ())),
        preferred_element_type=jnp.float32,
    )  # (TM, TN) f32

    diag = diag_ref[...]    # (TM, LW), lane-replicated -> full-vreg subtracts below
    acc = out_ref[...]      # (TM, LW)
    tn = sims_half.shape[1]
    lw = diag.shape[1]
    # Static 128-lane-aligned slices of a value: pure vreg selection, no relayout.
    # Each chunk: 1 VPU sub + 1 EUP tanh + 1 VPU add per element; no XLU, no masked stores.
    for c in range(tn // lw):
        acc = acc + jnp.tanh(sims_half[:, c * lw:(c + 1) * lw] - diag)
    out_ref[...] = acc


def recall_at_k(img_features, txt_features, *, tile_m=None, tile_n=None):
    """Pallas implementation of RecallatK.forward. Returns a scalar f32 loss."""
    n, d = img_features.shape
    assert txt_features.shape == (n, d)

    # TM is the lever on HBM traffic (img re-streamed N/TM times); TN on per-step
    # overhead.  512 keeps double-buffered tiles well inside the 64 MiB v7x VMEM for
    # typical D; bump per-chip if profiling shows headroom.
    tm = tile_m if tile_m is not None else min(n, 512)
    tn = tile_n if tile_n is not None else min(n, 512)
    # TODO(synk): ragged N (N not divisible by the tiles) would need masked tail tiles.
    assert n % tm == 0 and n % tn == 0, "N must be divisible by the tile sizes"

    # Lane width of the per-row state: 128 (lane-dense vregs / unmasked stores) whenever
    # the column tile allows it, otherwise fall back to tn (tiny-N demo path).
    lw = 128 if tn % 128 == 0 else tn

    f32 = jnp.float32
    itemsize = jnp.dtype(txt_features.dtype).itemsize

    # Fold the 0.5/temp scale into txt once (the txt tile is j-invariant in the kernel,
    # so an in-kernel scale would be repeated N/TN times).
    txt_scaled = txt_features * jnp.asarray(HALF_INV_TEMP, dtype=txt_features.dtype)
    # diag_half[i] = (0.5/temp) * <txt_i, img_i>, lane-replicated so the kernel's
    # per-step subtract is a full-vreg op with no lane broadcast.
    diag_half = jnp.einsum(
        "nd,nd->n", txt_scaled.astype(f32), img_features.astype(f32)
    )
    diag_rep = jnp.broadcast_to(diag_half[:, None], (n, lw))

    grid = (n // tm, n // tn)  # (row tiles: parallel, column tiles: reduction, last)

    # Rough VMEM need: double-buffered txt/img/diag tiles + revisited output + sims tile.
    vmem_est = (
        2 * (tm * d + tn * d) * itemsize
        + 2 * (tm * lw) * 4
        + 2 * (tm * lw) * 4
        + tm * tn * 4
    )
    vmem_limit = int(min(max(2 * vmem_est, 32 * 1024 * 1024), 64 * 1024 * 1024))

    tanh_sums = pl.pallas_call(
        _recall_at_k_kernel,
        out_shape=jax.ShapeDtypeStruct((n, lw), f32),
        grid_spec=pltpu.PrefetchScalarGridSpec(
            num_scalar_prefetch=0,
            grid=grid,
            in_specs=[
                pl.BlockSpec((tm, d), lambda i, j: (i, 0)),   # txt row tile (j-invariant)
                pl.BlockSpec((tn, d), lambda i, j: (j, 0)),   # img column tile (streamed)
                pl.BlockSpec((tm, lw), lambda i, j: (i, 0)),  # lane-replicated diag
            ],
            out_specs=pl.BlockSpec((tm, lw), lambda i, j: (i, 0)),
        ),
        compiler_params=pltpu.CompilerParams(
            dimension_semantics=("parallel", "arbitrary"),
            vmem_limit_bytes=vmem_limit,
        ),
        cost_estimate=pl.CostEstimate(
            flops=2 * n * n * d,
            transcendentals=n * n,
            bytes_accessed=int(
                ((n // tm) * n * d + n * d) * itemsize + 2 * n * lw * 4
            ),
        ),
    )(txt_scaled, img_features, diag_rep)

    # Tiny O(N*K) epilogue in plain JAX (also removes the old in-kernel K_VALS constant
    # capture).  Per row:
    #   sum_n sigmoid(z_mn) = 0.5*N + 0.5*sum_n tanh(z_mn/2)
    # and the diagonal term contributes exactly sigmoid(~0)=0.5 (tanh(~0)=0), so
    #   ranks_m = 1 + sum_{n!=m} sigmoid(z_mn) = 1 + 0.5*(N-1) + 0.5*T_m.
    t_sum = jnp.sum(tanh_sums, axis=1)                       # (N,)
    ranks = 1.0 + 0.5 * (n - 1) + 0.5 * t_sum                # (N,)
    k_row = jnp.asarray(K_VALS, dtype=f32)                   # (K,)
    rk = jnp.mean(jax.nn.sigmoid(k_row[None, :] - ranks[:, None]), axis=0)  # (K,)
    return jnp.mean(1.0 - rk)


def recall_at_k_ref(img_features, txt_features):
    """Pure-JAX reference mirroring the PyTorch module (off-diagonal sum via mask)."""
    sims = txt_features @ img_features.T
    n = sims.shape[0]
    diag = jnp.diagonal(sims)[:, None]
    sig = jax.nn.sigmoid((sims - diag) / TEMP)
    offdiag_mask = 1.0 - jnp.eye(n, dtype=sig.dtype)
    ranks = 1.0 + jnp.sum(sig * offdiag_mask, axis=1)
    loss = 0.0
    for k in K_VALS:
        rk = jnp.mean(jax.nn.sigmoid(k - ranks))
        loss = loss + (1.0 - rk) / len(K_VALS)
    return loss


if __name__ == "__main__":
    key = jax.random.PRNGKey(0)
    k_img, k_txt = jax.random.split(key)

    # Small demo shape consistent with the module: 8 image/text pairs, 32-dim embeddings.
    N, D = 8, 32
    img_features = jax.random.normal(k_img, (N, D), dtype=jnp.float32)
    txt_features = jax.random.normal(k_txt, (N, D), dtype=jnp.float32)

    loss = recall_at_k(img_features, txt_features)
    loss = jax.block_until_ready(loss)
    ref = recall_at_k_ref(img_features, txt_features)
    # Tolerance note: the diagonal is recomputed on the VPU (wrapper einsum) instead of
    # being read back from the MXU product; the last-ulp mismatch is amplified by
    # 1/temp = 100 before the (saturating) sigmoid, so allow slightly more than pure-f32
    # roundoff at the loss level.
    assert jnp.allclose(loss, ref, atol=5e-4, rtol=5e-4), (loss, ref)

    # Second check exercising the lane-dense (LW=128) multi-tile accumulation path
    # (grid (2, 2): parallel row tiles + column reduction with revisited output).
    key2 = jax.random.PRNGKey(0)
    k_img2, k_txt2 = jax.random.split(key2)
    N2, D2 = 256, 64
    img2 = jax.random.normal(k_img2, (N2, D2), dtype=jnp.float32)
    txt2 = jax.random.normal(k_txt2, (N2, D2), dtype=jnp.float32)
    loss2 = jax.block_until_ready(recall_at_k(img2, txt2, tile_m=128, tile_n=128))
    ref2 = recall_at_k_ref(img2, txt2)
    assert jnp.allclose(loss2, ref2, atol=5e-4, rtol=5e-4), (loss2, ref2)

    print("KERNEL_OK")
</pallas_src>

<mosaic_0001>
module attributes {stable_mosaic.version = 11 : i64} {
  func.func @_recall_at_k_kernel(%arg0: i32, %arg1: i32, %arg2: memref<8x32xf32, #tpu.memory_space<vmem>>, %arg3: memref<8x32xf32, #tpu.memory_space<vmem>>, %arg4: memref<8x8xf32, #tpu.memory_space<vmem>>, %arg5: memref<8x8xf32, #tpu.memory_space<vmem>>) attributes {dimension_semantics = [#tpu.dimension_semantics<parallel>, #tpu.dimension_semantics<arbitrary>], iteration_bounds = array<i64: 1, 1>, scalar_prefetch = 0 : i64, scratch_operands = 0 : i64, tpu.core_type = #tpu.core_type<tc>, window_params = [{transform_indices = @transform_0, window_bounds = array<i64: 8, 32>}, {transform_indices = @transform_1, window_bounds = array<i64: 8, 32>}, {transform_indices = @transform_2, window_bounds = array<i64: 8, 8>}, {transform_indices = @transform_3, window_bounds = array<i64: 8, 8>}]} {
    %c0_i32 = arith.constant 0 : i32
    %0 = arith.cmpi eq, %arg1, %c0_i32 : i32
    %1 = arith.extui %0 : i1 to i32
    %c0_i32_0 = arith.constant 0 : i32
    %2 = arith.cmpi ne, %1, %c0_i32_0 : i32
    scf.if %2 {
      %cst_10 = arith.constant 0.000000e+00 : f32
      %12 = vector.broadcast %cst_10 : f32 to vector<8x8xf32>
      %c0_11 = arith.constant 0 : index
      %c0_12 = arith.constant 0 : index
      %13 = vector.load %arg5[%c0_11, %c0_12] : memref<8x8xf32, #tpu.memory_space<vmem>>, vector<8x8xf32>
      tpu.vector_store %arg5[%c0_11, %c0_12], %12 {strides = array<i32>} : memref<8x8xf32, #tpu.memory_space<vmem>>, vector<8x8xf32>,
    } else {
    }
    %c0 = arith.constant 0 : index
    %c0_1 = arith.constant 0 : index
    %3 = vector.load %arg2[%c0, %c0_1] : memref<8x32xf32, #tpu.memory_space<vmem>>, vector<8x32xf32>
    %c0_2 = arith.constant 0 : index
    %c0_3 = arith.constant 0 : index
    %4 = vector.load %arg3[%c0_2, %c0_3] : memref<8x32xf32, #tpu.memory_space<vmem>>, vector<8x32xf32>
    %cst = arith.constant dense<0.000000e+00> : vector<8x8xf32>
    %5 = tpu.matmul %3, %4, %cst {dimension_numbers = #tpu.dot_dimension_numbers<[1], [1], [0], [0], [0, 0, 1, 0], [], []>} : vector<8x32xf32>, vector<8x32xf32>, vector<8x8xf32> -> vector<8x8xf32>
    %c0_4 = arith.constant 0 : index
    %c0_5 = arith.constant 0 : index
    %6 = vector.load %arg4[%c0_4, %c0_5] : memref<8x8xf32, #tpu.memory_space<vmem>>, vector<8x8xf32>
    %c0_6 = arith.constant 0 : index
    %c0_7 = arith.constant 0 : index
    %7 = vector.load %arg5[%c0_6, %c0_7] : memref<8x8xf32, #tpu.memory_space<vmem>>, vector<8x8xf32>
    %8 = arith.subf %5, %6 : vector<8x8xf32>
    %9 = math.tanh %8 : vector<8x8xf32>
    %10 = arith.addf %7, %9 : vector<8x8xf32>
    %c0_8 = arith.constant 0 : index
    %c0_9 = arith.constant 0 : index
    %11 = vector.load %arg5[%c0_8, %c0_9] : memref<8x8xf32, #tpu.memory_space<vmem>>, vector<8x8xf32>
    tpu.vector_store %arg5[%c0_8, %c0_9], %10 {strides = array<i32>} : memref<8x8xf32, #tpu.memory_space<vmem>>, vector<8x8xf32>,
    return
  }
  func.func @transform_0(%arg0: i32, %arg1: i32) -> (i32, i32) {
    %c0_i32 = arith.constant 0 : i32
    %c0_i32_0 = arith.constant 0 : i32
    return %arg0, %c0_i32 : i32, i32
  }
  func.func @transform_1(%arg0: i32, %arg1: i32) -> (i32, i32) {
    %c0_i32 = arith.constant 0 : i32
    %c0_i32_0 = arith.constant 0 : i32
    return %arg1, %c0_i32 : i32, i32
  }
  func.func @transform_2(%arg0: i32, %arg1: i32) -> (i32, i32) {
    %c0_i32 = arith.constant 0 : i32
    %c0_i32_0 = arith.constant 0 : i32
    return %arg0, %c0_i32 : i32, i32
  }
  func.func @transform_3(%arg0: i32, %arg1: i32) -> (i32, i32) {
    %c0_i32 = arith.constant 0 : i32
    %c0_i32_0 = arith.constant 0 : i32
    return %arg0, %c0_i32 : i32, i32
  }
}

</mosaic_0001>

<bundles_post_ra>
// kernel: tpu_custom_call.1
= control target key start
LH: loop header
LB: loop body
LE: loop exit
PB: predicated region body
PF: predicated region fallthrough
CT: control target
= control target key end

     0   :  { %8 = vsyncpa [#allocation3], 0  ;;  %s301_s0 = inlined_call_operand.hbm [shape: f32[8,32], index: 0, kind: input, shape index: {}]   ;;  %s302_s1 = inlined_call_operand.hbm [shape: f32[8,32], index: 1, kind: input, shape index: {}]   ;;  %s303_s2 = inlined_call_operand.hbm [shape: f32[8,8], index: 2, kind: input, shape index: {}]   ;;  %s304_s3 = inlined_call_operand.hbm [shape: f32[8,8], index: 3, kind: output, shape index: {}]  }
   0x1   :  { %9 = vsyncpa [#allocation6], 0 }
   0x2   :  { %10 = vsyncpa [#allocation4], 0  ;;  %s261_s12 = smov [#allocation5]   ;;  %s262_s14 = smov [#allocation2]  }
   0x3   :  { %s27_s13 = sshll.u32 %s261_s12, 4  ;;  %s17_s15 = sshll.u32 %s262_s14, 4  ;;  %s28_s13 = int_to_ptr.vmem [resolvable:$true] %s27_s13  ;;  %s18_s15 = int_to_ptr.vmem [resolvable:$true] %s17_s15 }
   0x4   :  { %s183_s16 = scalar_lea.vmem %s28_s13, 128  ;;  %p188_p1 = scmp.lt.s32.totalorder %s28_s13, %s28_s13 }
   0x5   :  { %p184_p0 = scmp.ne.s32.totalorder %s28_s13, %s183_s16  ;;  %p189_p2 = scmp.lt.s32.totalorder %s183_s16, %s183_s16 }
   0x7   :  { %p190_p3 = por %p189_p2, %p188_p1 }
   0x9   :  { %p191_p4 = pnand %p190_p3, %p184_p0 }
   0xb   :  { %194 = shalt.err (!%p191_p4)
}
   0xc   :  { %30 = dma.hbm_to_vmem [thread:$0]  %s302_s1, 128, %s28_s13, [#allocation6]  }
   0xd   :  { %s203_s19 = scalar_lea.vmem %s18_s15, 128  ;;  %p208_p6 = scmp.lt.s32.totalorder %s18_s15, %s18_s15 }
   0xe   :  { %p204_p5 = scmp.ne.s32.totalorder %s18_s15, %s203_s19  ;;  %p209_p7 = scmp.lt.s32.totalorder %s203_s19, %s203_s19 }
  0x10   :  { %p210_p8 = por %p209_p7, %p208_p6 }
  0x12   :  { %p211_p9 = pnand %p210_p8, %p204_p5 }
  0x14   :  { %214 = shalt.err (!%p211_p9)
}
  0x15   :  { %20 = dma.hbm_to_vmem [thread:$0]  %s301_s0, 128, %s18_s15, [#allocation3]  }
  0x16   :  { %s263_s22 = smov [#allocation7]  }
  0x17   :  { %s37_s23 = sshll.u32 %s263_s22, 4  ;;  %s38_s23 = int_to_ptr.vmem [resolvable:$true] %s37_s23 }
  0x18   :  { %s223_s24 = scalar_lea.vmem %s38_s23, 128  ;;  %p228_p11 = scmp.lt.s32.totalorder %s38_s23, %s38_s23 }
  0x19   :  { %p224_p10 = scmp.ne.s32.totalorder %s38_s23, %s223_s24  ;;  %p229_p12 = scmp.lt.s32.totalorder %s223_s24, %s223_s24 }
  0x1b   :  { %p230_p13 = por %p229_p12, %p228_p11 }
  0x1d   :  { %p231_p0 = pnand %p230_p13, %p224_p10 }
  0x1f   :  { %234 = shalt.err (!%p231_p0)
}
  0x20   :  { %40 = dma.hbm_to_vmem [thread:$0]  %s303_s2, 128, %s38_s23, [#allocation6]  }
  0x21   :  { %255 = dma.done.wait [#allocation3], 128  }
  0x22   :  { %256 = vsyncadd [#allocation3], 4294967168 }
  0x23   :  { %257 = dma.done.wait [#allocation6], 256  }
  0x24   :  { %258 = vsyncadd [#allocation6], 4294967040  ;;  %vm54_vm0 = vcmask 64512   ;;  %v264_v0 = vmov 0.0   ;;  %vm265_vm1 = vmmov 0   ;;  %vm58_vm2 = vcmask 261120  }
  0x25   :  { %55 = vst.msk [vmem:[#allocation8] sm:$0xff] %vm54_vm0, %v264_v0  ;;  %162 = vmatprep.subr.mxu0 %v264_v0  ;;  %164 = vmatprep.mubr.msk.f32.mxu0 %vm265_vm1, %v264_v0  ;;  %v57_v1 = vld [vmem:[#allocation5] sm:$0xff]  ;;  %v56_v2 = vld [vmem:[#allocation2] sm:$0xff]  ;;  %v135_v3 = vld [vmem:[#allocation7] sm:$0xff]  ;;  %s266_s0 = smov [#allocation8]  }
  0x26   :  { %163 = vmatpush3.xpose.msk.msra.mxu0 %vm58_vm2, %v57_v1  ;;  %s148_s2 = sshll.u32 %s266_s0, 4  ;;  %s149_s2 = int_to_ptr.vmem [resolvable:$true] %s148_s2 }
  0x27   :  { %s235_s26 = scalar_lea.vmem %s149_s2, 128  ;;  %p240_p2 = scmp.lt.s32.totalorder %s149_s2, %s149_s2 }
  0x28   :  { %p236_p1 = scmp.ne.s32.totalorder %s149_s2, %s235_s26  ;;  %p241_p3 = scmp.lt.s32.totalorder %s235_s26, %s235_s26 }
  0x29   :  { %165 = vmatmul.mubr.msk.f32.vlgmr.msra.gmra.mxu0 %vm58_vm2, %v56_v2 }
  0x2a   :  { %p242_p4 = por %p241_p3, %p240_p2 }
  0x2c   :  { %v136_v7 = vld [vmem:[#allocation8] sm:$0xff]  ;;  %p243_p5 = pnand %p242_p4, %p236_p1 }
  0xe9   :  { %v131_v4 = vpop.f32.mrf.mxu0 }
  0xea   :  { %v137_v5 = vsub.f32 %v131_v4, %v135_v3 }
  0xeb   :  { %v166_v6 = vpop.f32.mrf.mxu0 }
  0xec   :  { %173 = vtanh.f32 %v137_v5 }
  0xf9   :  { %v174_v8 = vpop.eup %173 }
  0xfa   :  { %v139_v9 = vadd.f32 %v174_v8, %v136_v7 }
  0xfc   :  { %141 = vst.msk [vmem:[#allocation8] sm:$0xff] %vm54_vm0, %v139_v9 }
  0xfd   :  { %246 = shalt.err (!%p243_p5)
}
  0xfe   :  { %151 = dma.vmem_to_hbm [thread:$0]  %s149_s2, 128, %s304_s3, [#allocation4]  }
  0xff   :  { %259 = dma.done.wait [#allocation4], 128  }
 0x100   :  { %260 = vsyncadd [#allocation4], 4294967168 }
 0x101   :  { %155 = vsyncpa [#allocation3], 1 }
 0x102   :  { %156 = vsyncpa [#allocation6], 1 }
 0x103   :  { %157 = vsyncpa [#allocation4], 1 }

</bundles_post_ra>
